<compile_context>
chip_gen: v7x
topology: tpu7x:2x2x1
jax: 0.10.0
libtpu: 0.0.40
codegen_flags: <defaults>
</compile_context>

<pallas_src>
import functools

import jax
import jax.numpy as jnp
from jax import lax
from jax.experimental import pallas as pl
from jax.experimental.pallas import tpu as pltpu


def _round_up(x, m):
    return ((x + m - 1) // m) * m


def _decoder_kernel(x_ref, w_ref, b_ref, o_ref, acc_ref, *, use_act):
    """Computes one (tm, tn) output tile, accumulated over the K grid axis.

    x_ref:   (tm, tk)  activation rows
    w_ref:   (tn, tk)  weight block in native PyTorch (out_dim, in_dim) layout
    b_ref:   (1,  tn)  bias block
    o_ref:   (tm, tn)  output tile (tn is a multiple of 128 -> lane-dense store)
    acc_ref: (tm, tn)  float32 accumulator scratch
    """
    k = pl.program_id(2)

    @pl.when(k == 0)
    def _():
        acc_ref[...] = jnp.zeros_like(acc_ref)

    # Contract x's last dim against weight's last dim (no wrapper transpose);
    # f32 accumulation on the MXU.
    acc_ref[...] += lax.dot_general(
        x_ref[...], w_ref[...],
        dimension_numbers=(((1,), (1,)), ((), ())),
        preferred_element_type=jnp.float32)

    @pl.when(k == pl.num_programs(2) - 1)
    def _():
        acc = acc_ref[...] + b_ref[...].astype(jnp.float32)
        if use_act:
            acc = jnp.maximum(acc, 0.0)
        o_ref[...] = acc.astype(o_ref.dtype)


def decoder_forward(x, weight, bias, *, use_act=True, tm=256, tn=256, tk=512):
    """relu(x @ weight.T + bias) (relu optional), like nn.Linear(+ReLU).

    x:      (..., in_dim)        — leading dims flattened like nn.Linear
    weight: (out_dim, in_dim)    — native PyTorch Linear layout (NOT transposed)
    bias:   (out_dim,)
    """
    orig_shape = x.shape
    in_dim = orig_shape[-1]
    out_dim, in_dim_w = weight.shape
    assert in_dim == in_dim_w, "in_dim mismatch between x and weight"

    x2 = x.reshape(-1, in_dim)
    n_rows = x2.shape[0]

    # ---- tile sizes -------------------------------------------------------
    itemsize = jnp.dtype(x.dtype).itemsize
    w_itemsize = jnp.dtype(weight.dtype).itemsize
    sublane = {4: 8, 2: 16, 1: 32}.get(itemsize, 8)

    # Row tile: big for throughput, clamped (and sublane-rounded) for small N.
    tm = max(sublane, min(tm, _round_up(n_rows, sublane)))

    # Lane-pad out_dim to a multiple of 128 so output stores are unmasked.
    out_pad = _round_up(out_dim, 128)
    tn = min(tn, out_pad)
    if out_pad % tn != 0:
        tn = 128            # out_pad is always a multiple of 128

    # K tiling only for large hidden sizes; zero-padding K is exact.
    if in_dim <= 2048:
        tk = in_dim
        k_pad = in_dim
    else:
        tk = _round_up(min(tk, 2048), 128)
        k_pad = _round_up(in_dim, tk)

    # ---- (cheap, only-if-needed) padding of weight / bias / x over K -------
    w_p = weight
    b_p = bias.reshape(1, out_dim)
    if out_pad != out_dim or k_pad != in_dim:
        w_p = jnp.pad(weight, ((0, out_pad - out_dim), (0, k_pad - in_dim)))
    if out_pad != out_dim:
        b_p = jnp.pad(b_p, ((0, 0), (0, out_pad - out_dim)))
    if k_pad != in_dim:
        x2 = jnp.pad(x2, ((0, 0), (0, k_pad - in_dim)))
    # Rows are NOT padded: the tail row-block is a Pallas partial block
    # (OOB reads feed rows whose output writes are masked off).

    grid = (pl.cdiv(n_rows, tm), out_pad // tn, k_pad // tk)

    # ---- VMEM budget: working set + headroom, capped at 75% of capacity ----
    working_set = (2 * tm * tk * itemsize        # x tile, double-buffered
                   + 2 * tn * tk * w_itemsize    # weight tile, double-buffered
                   + 2 * tn * w_itemsize         # bias tile
                   + 2 * tm * tn * itemsize      # output tile, double-buffered
                   + tm * tn * 4)                # f32 accumulator scratch
    try:
        vmem_cap = pltpu.get_tpu_info().vmem_capacity_bytes
    except Exception:
        vmem_cap = 64 << 20                      # conservative: v7x per-TC VMEM
    vmem_limit = min(max(int(working_set * 1.5) + (4 << 20), 32 << 20),
                     (vmem_cap * 3) // 4)

    cost = pl.CostEstimate(
        flops=2 * n_rows * in_dim * out_dim,
        transcendentals=0,
        bytes_accessed=int(x2.size) * itemsize
        + int(w_p.size) * w_itemsize
        + int(b_p.size) * w_itemsize
        + n_rows * out_pad * itemsize)

    kernel = functools.partial(_decoder_kernel, use_act=bool(use_act))

    out = pl.pallas_call(
        kernel,
        out_shape=jax.ShapeDtypeStruct((n_rows, out_pad), x.dtype),
        grid_spec=pltpu.PrefetchScalarGridSpec(
            num_scalar_prefetch=0,
            grid=grid,
            in_specs=[
                pl.BlockSpec((tm, tk), lambda m, n, k: (m, k)),   # x rows
                pl.BlockSpec((tn, tk), lambda m, n, k: (n, k)),   # weight (native layout)
                pl.BlockSpec((1, tn), lambda m, n, k: (0, n)),    # bias
            ],
            out_specs=pl.BlockSpec((tm, tn), lambda m, n, k: (m, n)),
            scratch_shapes=[pltpu.VMEM((tm, tn), jnp.float32)],
        ),
        compiler_params=pltpu.CompilerParams(
            dimension_semantics=("parallel", "parallel", "arbitrary"),
            vmem_limit_bytes=int(vmem_limit),
        ),
        cost_estimate=cost,
    )(x2, w_p, b_p)

    if out_pad != out_dim:
        out = out[:, :out_dim]
    return out.reshape(orig_shape[:-1] + (out_dim,))


def decoder_reference(x, weight, bias, use_act=True):
    y = jnp.einsum("...i,oi->...o", x, weight) + bias
    if use_act:
        y = jnp.maximum(y, 0.0)
    return y


if __name__ == "__main__":
    # Small deterministic shapes consistent with the module: a (2, 10) batch of
    # feature vectors (20 rows after flatten — exercises the partial row tile),
    # in_dim=32, out_dim=64 (exercises the lane-padding path).
    B, T, in_dim, out_dim = 2, 10, 32, 64

    key = jax.random.PRNGKey(0)
    kx, kw, kb = jax.random.split(key, 3)
    x = jax.random.normal(kx, (B, T, in_dim), dtype=jnp.float32)
    weight = jax.random.normal(kw, (out_dim, in_dim), dtype=jnp.float32) * 0.1
    bias = jax.random.normal(kb, (out_dim,), dtype=jnp.float32) * 0.1

    # use_act=True path (Linear + ReLU)
    out = decoder_forward(x, weight, bias, use_act=True)
    out = jax.block_until_ready(out)
    ref = decoder_reference(x, weight, bias, use_act=True)
    assert out.shape == (B, T, out_dim)
    assert jnp.allclose(out, ref, atol=1e-5, rtol=1e-5), "mismatch (use_act=True)"

    # use_act=False path (plain Linear)
    out_na = decoder_forward(x, weight, bias, use_act=False)
    out_na = jax.block_until_ready(out_na)
    ref_na = decoder_reference(x, weight, bias, use_act=False)
    assert jnp.allclose(out_na, ref_na, atol=1e-5, rtol=1e-5), "mismatch (use_act=False)"

    print("KERNEL_OK")
</pallas_src>

<mosaic_0001>
module attributes {stable_mosaic.version = 11 : i64} {
  func.func @_decoder_kernel(%arg0: i32, %arg1: i32, %arg2: i32, %arg3: memref<24x32xf32, #tpu.memory_space<vmem>>, %arg4: memref<128x32xf32, #tpu.memory_space<vmem>>, %arg5: memref<1x128xf32, #tpu.memory_space<vmem>>, %arg6: memref<24x128xf32, #tpu.memory_space<vmem>>, %arg7: memref<24x128xf32, #tpu.memory_space<vmem>>) attributes {dimension_semantics = [#tpu.dimension_semantics<parallel>, #tpu.dimension_semantics<parallel>, #tpu.dimension_semantics<arbitrary>], iteration_bounds = array<i64: 1, 1, 1>, scalar_prefetch = 0 : i64, scratch_operands = 1 : i64, tpu.core_type = #tpu.core_type<tc>, window_params = [{transform_indices = @transform_0, window_bounds = array<i64: 24, 32>}, {transform_indices = @transform_1, window_bounds = array<i64: 128, 32>}, {transform_indices = @transform_2, window_bounds = array<i64: 1, 128>}, {transform_indices = @transform_3, window_bounds = array<i64: 24, 128>}]} {
    %c0_i32 = arith.constant 0 : i32
    %0 = arith.cmpi eq, %arg2, %c0_i32 : i32
    %1 = arith.extui %0 : i1 to i32
    %c0_i32_0 = arith.constant 0 : i32
    %2 = arith.cmpi ne, %1, %c0_i32_0 : i32
    scf.if %2 {
      %cst_10 = arith.constant 0.000000e+00 : f32
      %12 = vector.broadcast %cst_10 : f32 to vector<24x128xf32>
      %c0_11 = arith.constant 0 : index
      %c0_12 = arith.constant 0 : index
      %13 = vector.load %arg7[%c0_11, %c0_12] : memref<24x128xf32, #tpu.memory_space<vmem>>, vector<24x128xf32>
      tpu.vector_store %arg7[%c0_11, %c0_12], %12 {strides = array<i32>} : memref<24x128xf32, #tpu.memory_space<vmem>>, vector<24x128xf32>,
    } else {
    }
    %c0 = arith.constant 0 : index
    %c0_1 = arith.constant 0 : index
    %3 = vector.load %arg7[%c0, %c0_1] : memref<24x128xf32, #tpu.memory_space<vmem>>, vector<24x128xf32>
    %c0_2 = arith.constant 0 : index
    %c0_3 = arith.constant 0 : index
    %4 = vector.load %arg3[%c0_2, %c0_3] : memref<24x32xf32, #tpu.memory_space<vmem>>, vector<24x32xf32>
    %c0_4 = arith.constant 0 : index
    %c0_5 = arith.constant 0 : index
    %5 = vector.load %arg4[%c0_4, %c0_5] : memref<128x32xf32, #tpu.memory_space<vmem>>, vector<128x32xf32>
    %cst = arith.constant dense<0.000000e+00> : vector<24x128xf32>
    %6 = tpu.matmul %4, %5, %cst {dimension_numbers = #tpu.dot_dimension_numbers<[1], [1], [0], [0], [0, 0, 1, 0], [], []>} : vector<24x32xf32>, vector<128x32xf32>, vector<24x128xf32> -> vector<24x128xf32>
    %7 = arith.addf %3, %6 : vector<24x128xf32>
    %c0_6 = arith.constant 0 : index
    %c0_7 = arith.constant 0 : index
    %8 = vector.load %arg7[%c0_6, %c0_7] : memref<24x128xf32, #tpu.memory_space<vmem>>, vector<24x128xf32>
    tpu.vector_store %arg7[%c0_6, %c0_7], %7 {strides = array<i32>} : memref<24x128xf32, #tpu.memory_space<vmem>>, vector<24x128xf32>,
    %c0_i32_8 = arith.constant 0 : i32
    %9 = arith.cmpi eq, %arg2, %c0_i32_8 : i32
    %10 = arith.extui %9 : i1 to i32
    %c0_i32_9 = arith.constant 0 : i32
    %11 = arith.cmpi ne, %10, %c0_i32_9 : i32
    scf.if %11 {
      %c0_10 = arith.constant 0 : index
      %c0_11 = arith.constant 0 : index
      %12 = vector.load %arg7[%c0_10, %c0_11] : memref<24x128xf32, #tpu.memory_space<vmem>>, vector<24x128xf32>
      %c0_12 = arith.constant 0 : index
      %c0_13 = arith.constant 0 : index
      %13 = vector.load %arg5[%c0_12, %c0_13] : memref<1x128xf32, #tpu.memory_space<vmem>>, vector<1x128xf32>
      %14 = vector.broadcast %13 : vector<1x128xf32> to vector<24x128xf32>
      %15 = arith.addf %12, %14 : vector<24x128xf32>
      %cst_14 = arith.constant 0.000000e+00 : f32
      %16 = vector.broadcast %cst_14 : f32 to vector<24x128xf32>
      %17 = arith.maximumf %15, %16 : vector<24x128xf32>
      %c0_15 = arith.constant 0 : index
      %c0_16 = arith.constant 0 : index
      %18 = vector.load %arg6[%c0_15, %c0_16] : memref<24x128xf32, #tpu.memory_space<vmem>>, vector<24x128xf32>
      tpu.vector_store %arg6[%c0_15, %c0_16], %17 {strides = array<i32>} : memref<24x128xf32, #tpu.memory_space<vmem>>, vector<24x128xf32>,
    } else {
    }
    return
  }
  func.func @transform_0(%arg0: i32, %arg1: i32, %arg2: i32) -> (i32, i32) {
    %c0_i32 = arith.constant 0 : i32
    return %arg0, %arg2 : i32, i32
  }
  func.func @transform_1(%arg0: i32, %arg1: i32, %arg2: i32) -> (i32, i32) {
    %c0_i32 = arith.constant 0 : i32
    return %arg1, %arg2 : i32, i32
  }
  func.func @transform_2(%arg0: i32, %arg1: i32, %arg2: i32) -> (i32, i32) {
    %c0_i32 = arith.constant 0 : i32
    %c0_i32_0 = arith.constant 0 : i32
    return %c0_i32, %arg1 : i32, i32
  }
  func.func @transform_3(%arg0: i32, %arg1: i32, %arg2: i32) -> (i32, i32) {
    %c0_i32 = arith.constant 0 : i32
    return %arg0, %arg1 : i32, i32
  }
}

</mosaic_0001>

<bundles_post_ra>
// kernel: tpu_custom_call.1
= control target key start
LH: loop header
LB: loop body
LE: loop exit
PB: predicated region body
PF: predicated region fallthrough
CT: control target
= control target key end

     0   :  { %vm44_vm0 = vcmask 261120   ;;  %v384_v2 = vmov 0.0|0.0   ;;  %vm385_vm2 = vmmov 0   ;;  %v386_v5 = vmov 0.0   ;;  %s526_s0 = inlined_call_operand.vmem [shape: f32[20,32], index: 0, kind: input, shape index: {}]   ;;  %s527_s1 = inlined_call_operand.vmem [shape: f32[128,32], index: 1, kind: input, shape index: {}]   ;;  %s528_s2 = inlined_call_operand.vmem [shape: f32[1,128], index: 2, kind: input, shape index: {}]   ;;  %s529_s3 = inlined_call_operand.hbm [shape: f32[20,128], index: 3, kind: output, shape index: {}]  }
   0x1   :  { %v28_v0 = vld [vmem:[%s527_s1] sm:$0xff]  ;;  %v29_v1 = vld [vmem:[%s527_s1 + $0x8] sm:$0xff]  ;;  %338 = vmatprep.subr.bf16.mxu1 %v384_v2  ;;  %vm418_vm1 = vmpackc.low %vm44_vm0, %vm44_vm0  ;;  %306 = vmatprep.subr.bf16.mxu0 %v384_v2 }
   0x2   :  { %v307_v3 = vpack.c.bf16 %v29_v1, %v28_v0  ;;  %300 = vmatprep.mubr.msk.f32.mxu1 %vm385_vm2, %v386_v5  ;;  %297 = vmatprep.mubr.msk.f32.mxu0 %vm385_vm2, %v386_v5  ;;  %v30_v6 = vld [vmem:[%s527_s1 + $0x10] sm:$0xff]  ;;  %v31_v7 = vld [vmem:[%s527_s1 + $0x18] sm:$0xff] }
   0x4   :  { %346 = vmatpush3.bf16.xpose.msk.msra.mxu1 %vm418_vm1, %v307_v3  ;;  %309 = vmatpush3.bf16.xpose.msk.msra.mxu0 %vm418_vm1, %v307_v3 }
   0x5   :  { %339 = vmatprep.subr.bf16.mxu1 %v384_v2  ;;  %310 = vmatprep.subr.bf16.mxu0 %v384_v2 }
   0x6   :  { %8 = vsyncpa [#allocation4], 0  ;;  %v311_v8 = vpack.c.bf16 %v31_v7, %v30_v6  ;;  %v32_v9 = vld [vmem:[%s527_s1 + $0x20] sm:$0xff]  ;;  %v33_v10 = vld [vmem:[%s527_s1 + $0x28] sm:$0xff]  ;;  %s387_s24 = smov [#allocation3]  }
   0x7   :  { %v315_v11 = vpack.c.bf16 %v33_v10, %v32_v9  ;;  %v34_v12 = vld [vmem:[%s527_s1 + $0x30] sm:$0xff]  ;;  %v35_v13 = vld [vmem:[%s527_s1 + $0x38] sm:$0xff]  ;;  %v36_v15 = vld [vmem:[%s527_s1 + $0x40] sm:$0xff]  ;;  %s215_s25 = sshll.u32 %s387_s24, 4  ;;  %s216_s25 = int_to_ptr.vmem [resolvable:$true] %s215_s25 }
   0x8   :  { %v319_v14 = vpack.c.bf16 %v35_v13, %v34_v12  ;;  %v37_v16 = vld [vmem:[%s527_s1 + $0x48] sm:$0xff]  ;;  %v38_v18 = vld [vmem:[%s527_s1 + $0x50] sm:$0xff]  ;;  %v39_v19 = vld [vmem:[%s527_s1 + $0x58] sm:$0xff]  ;;  %p365_p1 = scmp.lt.s32.totalorder %s216_s25, %s216_s25 }
   0x9   :  { %v323_v17 = vpack.c.bf16 %v37_v16, %v36_v15  ;;  %v327_v20 = vpack.c.bf16 %v39_v19, %v38_v18  ;;  %v40_v21 = vld [vmem:[%s527_s1 + $0x60] sm:$0xff]  ;;  %v41_v22 = vld [vmem:[%s527_s1 + $0x68] sm:$0xff]  ;;  %v42_v24 = vld [vmem:[%s527_s1 + $0x70] sm:$0xff] }
   0xa   :  { %v331_v23 = vpack.c.bf16 %v41_v22, %v40_v21  ;;  %v43_v25 = vld [vmem:[%s527_s1 + $0x78] sm:$0xff]  ;;  %v26_v27 = vld [vmem:[%s526_s0 + $0x8] sm:$0xff]  ;;  %v25_v28 = vld [vmem:[%s526_s0] sm:$0xff] }
   0xb   :  { %v335_v26 = vpack.c.bf16 %v43_v25, %v42_v24  ;;  %v27_v29 = vld [vmem:[%s526_s0 + $0x10] sm:$0xff]  ;;  %v245_v30 = vld [vmem:[%s528_s2] ss:$0 sm:$0xff]  ;;  %s360_s0 = scalar_lea.vmem %s216_s25, 384 }
   0xc   :  { %347 = vmatpush3.bf16.xpose.msk.msra.mxu1 %vm418_vm1, %v311_v8  ;;  %313 = vmatpush3.bf16.xpose.msk.msra.mxu0 %vm418_vm1, %v311_v8  ;;  %p361_p0 = scmp.ne.s32.totalorder %s216_s25, %s360_s0  ;;  %p366_p2 = scmp.lt.s32.totalorder %s360_s0, %s360_s0 }
   0xd   :  { %340 = vmatprep.subr.bf16.mxu1 %v384_v2  ;;  %314 = vmatprep.subr.bf16.mxu0 %v384_v2 }
   0xe   :  { %p367_p3 = por %p366_p2, %p365_p1 }
  0x10   :  { %p368_p4 = pnand %p367_p3, %p361_p0 }
  0x14   :  { %348 = vmatpush3.bf16.xpose.msk.msra.mxu1 %vm418_vm1, %v315_v11  ;;  %317 = vmatpush3.bf16.xpose.msk.msra.mxu0 %vm418_vm1, %v315_v11 }
  0x15   :  { %341 = vmatprep.subr.bf16.mxu1 %v384_v2  ;;  %318 = vmatprep.subr.bf16.mxu0 %v384_v2 }
  0x1c   :  { %349 = vmatpush3.bf16.xpose.msk.msra.mxu1 %vm418_vm1, %v319_v14  ;;  %321 = vmatpush3.bf16.xpose.msk.msra.mxu0 %vm418_vm1, %v319_v14 }
  0x1d   :  { %342 = vmatprep.subr.bf16.mxu1 %v384_v2  ;;  %322 = vmatprep.subr.bf16.mxu0 %v384_v2 }
  0x24   :  { %350 = vmatpush3.bf16.xpose.msk.msra.mxu1 %vm418_vm1, %v323_v17  ;;  %325 = vmatpush3.bf16.xpose.msk.msra.mxu0 %vm418_vm1, %v323_v17 }
  0x25   :  { %343 = vmatprep.subr.bf16.mxu1 %v384_v2  ;;  %326 = vmatprep.subr.bf16.mxu0 %v384_v2 }
  0x2c   :  { %351 = vmatpush3.bf16.xpose.msk.msra.mxu1 %vm418_vm1, %v327_v20  ;;  %329 = vmatpush3.bf16.xpose.msk.msra.mxu0 %vm418_vm1, %v327_v20 }
  0x2d   :  { %344 = vmatprep.subr.bf16.mxu1 %v384_v2  ;;  %330 = vmatprep.subr.bf16.mxu0 %v384_v2 }
  0x34   :  { %352 = vmatpush3.bf16.xpose.msk.msra.mxu1 %vm418_vm1, %v331_v23  ;;  %333 = vmatpush3.bf16.xpose.msk.msra.mxu0 %vm418_vm1, %v331_v23 }
  0x35   :  { %345 = vmatprep.subr.bf16.mxu1 %v384_v2  ;;  %334 = vmatprep.subr.bf16.mxu0 %v384_v2 }
  0x3c   :  { %353 = vmatpush3.bf16.xpose.msk.msra.mxu1 %vm418_vm1, %v335_v26  ;;  %337 = vmatpush3.bf16.xpose.msk.msra.mxu0 %vm418_vm1, %v335_v26 }
  0x43   :  { %301 = vmatmul.mubr.msk.f32.vlgmr.msra.gmra.mrb[0].mxu1 %vm44_vm0, %v26_v27  ;;  %298 = vmatmul.mubr.msk.f32.vlgmr.msra.gmra.mrb[0].mxu0 %vm44_vm0, %v25_v28 }
  0x44   :  { %303 = vmatprep.mubr.msk.f32.mxu1 %vm385_vm2, %v386_v5 }
  0x47   :  { %304 = vmatmul.mubr.msk.f32.gmra.mrb[2].mxu1 %vm44_vm0, %v27_v29 }
 0x116   :  { %v173_v31 = vpop.f32.mrb[0].mxu1  ;;  %v168_v32 = vpop.f32.mrb[0].mxu0 }
 0x117   :  { %v202_v33 = vadd.f32 %v245_v30, %v173_v31  ;;  %v302_v34 = vpop.f32.mrb[1].mxu1  ;;  %v201_v35 = vadd.f32 %v245_v30, %v168_v32  ;;  %v299_v36 = vpop.f32.mrb[1].mxu0 }
 0x119   :  { %v205_v37 = vmax.f32 %v202_v33, 0.0  ;;  %v204_v38 = vmax.f32 %v201_v35, 0.0 }
 0x11a   :  { %v178_v39 = vpop.f32.mrb[2].mxu1 }
 0x11b   :  { %208 = vst [vmem:[#allocation3 + $0x8] sm:$0xff] %v205_v37  ;;  %207 = vst [vmem:[#allocation3] sm:$0xff] %v204_v38  ;;  %v203_v40 = vadd.f32 %v245_v30, %v178_v39  ;;  %v305_v41 = vpop.f32.mrb[3].mxu1 }
 0x11d   :  { %v206_v42 = vmax.f32 %v203_v40, 0.0 }
 0x11f   :  { %209 = vst [vmem:[#allocation3 + $0x10] sm:$0xff] %v206_v42 }
 0x120   :  { %371 = shalt.err (!%p368_p4)
}
 0x121   :  { %s372_s27 = scalar_lea.hbm %s529_s3, 384 }
 0x122   :  { %p373_p5 = scmp.ne.s32.totalorder %s529_s3, %s372_s27  ;;  %p376_p6 = scmp.lt.u32.totalorder %s372_s27, %s529_s3 }
 0x124   :  { %p378_p7 = pnand %p376_p6, %p373_p5 }
 0x126   :  { %381 = shalt.err (!%p378_p7)
}
 0x127   :  { %s388_s5 = smov 128   ;;  %s389_s6 = smov 8  }
 0x128   :  { %221 = dma.vmem_to_hbm [thread:$0]  %s216_s25, 384, %s529_s3, [#allocation4], %s388_s5, %s388_s5, %s389_s6  }
 0x129   :  { %382 = dma.done.wait [#allocation4], 384  }
 0x12a   :  { %383 = vsyncadd [#allocation4], 4294966912 }
 0x12b   :  { %225 = vsyncpa [#allocation4], 1 }

</bundles_post_ra>
